<compile_context>
chip_gen: v5e
topology: v5e:2x2
jax: 0.10.0
libtpu: 0.0.40
codegen_flags: <defaults>
</compile_context>

<pallas_src>
import jax
import jax.numpy as jnp
from jax import lax
from jax.experimental import pallas as pl
from jax.experimental.pallas import tpu as pltpu


# ----------------------------------------------------------------------------
# Pallas kernel: full tanh-RNN recurrence over a VMEM-resident sequence.
# Single invocation (no time grid); hidden state carried in vregs through a
# statically unrolled time loop; output written batch-first.
# ----------------------------------------------------------------------------
def _rnn_recurrence_kernel(xp_ref, whhT_ref, out_ref):
    # xp_ref : (T, B, H)  pre-projected inputs  (x @ W_ih^T + b_ih + b_hh), f32
    # whhT_ref: (H, H)    W_hh^T, loaded once and kept resident
    # out_ref: (B, T, H)  batch-first output (matches torch batch_first=True)
    seq_len = xp_ref.shape[0]
    whhT = whhT_ref[...]

    # Peeled t = 0: PyTorch default h0 = 0, so the first step is just tanh(xp_0)
    # -- no wasted 0 @ W_hh^T matmul on the serial chain.
    h = jnp.tanh(xp_ref[0])
    out_ref[:, 0, :] = h

    # T is a small compile-time constant here, so a static Python unroll gives
    # static store indices and full scheduler visibility.
    # TODO(synk): for large T, switch to lax.fori_loop with a bounded unroll
    # (and a time-chunked grid) instead of full static unroll.
    for t in range(1, seq_len):
        gate = xp_ref[t] + jnp.dot(h, whhT, preferred_element_type=jnp.float32)
        h = jnp.tanh(gate)
        out_ref[:, t, :] = h


def rnn_recurrence_pallas(xp_tbh, w_hh_T):
    """xp_tbh: (T, B, H) pre-projected inputs (x W_ih^T + b_ih + b_hh), f32.
    w_hh_T: (H, H) = W_hh^T.  Returns batch-first output (B, T, H)."""
    T, B, H = xp_tbh.shape
    # Explicit VMEM budget: xp + out + W (f32), generous headroom, capped well
    # under the smallest physical VMEM (v7x: 64 MiB).
    bytes_needed = 4 * (2 * T * B * H + H * H)
    vmem_limit = int(min(max(8 * bytes_needed, 4 << 20), 64 << 20))
    return pl.pallas_call(
        _rnn_recurrence_kernel,
        out_shape=jax.ShapeDtypeStruct((B, T, H), jnp.float32),
        in_specs=[
            pl.BlockSpec(memory_space=pltpu.MemorySpace.VMEM),   # xp (whole block)
            pl.BlockSpec(memory_space=pltpu.MemorySpace.VMEM),   # W_hh^T (resident)
        ],
        out_specs=pl.BlockSpec(memory_space=pltpu.MemorySpace.VMEM),
        compiler_params=pltpu.CompilerParams(vmem_limit_bytes=vmem_limit),
    )(xp_tbh, w_hh_T)


# ----------------------------------------------------------------------------
# Encoder forward:
#   embedding + input projection + biases folded into a (V,H) table; layer-0
#   inputs gathered time-major directly; Pallas kernel handles the serial
#   recurrence and emits batch-first output (no activation transposes at all).
# ----------------------------------------------------------------------------
@jax.jit
def encoder_forward(tokens, embed_table, rnn_params):
    """tokens: (B, T) int32.  Returns (output (B, T, H), hidden (L, B, H))."""
    # Dropout with p=0.0 / eval mode is the identity.
    # TODO(synk): training-mode dropout would need pltpu.prng_* in-kernel and
    # cannot match torch RNG bit-for-bit, so it is omitted (p=0 here).
    hiddens = []
    layer_out_bf = None                                  # batch-first (B, T, H)
    for layer_idx, (w_ih, w_hh, b_ih, b_hh) in enumerate(rnn_params):
        bias = b_ih + b_hh                               # pre-combined biases
        w_hh_T = w_hh.T                                  # pre-transposed recurrence weight
        if layer_idx == 0:
            # Fold embedding lookup + input projection + biases into one table:
            #   P = E @ W_ih^T + b   (V, H);  gather time-major directly.
            proj_table = embed_table @ w_ih.T + bias     # (V, H)
            xp = proj_table[tokens.T]                    # (T, B, H) -- no transpose
        else:
            # Hoisted bulk input projection for stacked layers (batch-first in,
            # time-major out for the kernel).
            xp = jnp.einsum('bte,he->tbh', layer_out_bf, w_ih) + bias

        layer_out_bf = rnn_recurrence_pallas(xp, w_hh_T)  # (B, T, H)
        hiddens.append(layer_out_bf[:, -1, :][None])      # final h of this layer

    output = layer_out_bf                                 # already batch-first
    hidden = jnp.concatenate(hiddens, axis=0)             # (num_layers, B, H)
    return output, hidden


# ----------------------------------------------------------------------------
# Pure-JAX reference (mirrors torch nn.RNN semantics) for correctness check.
# ----------------------------------------------------------------------------
def encoder_reference(tokens, embed_table, rnn_params):
    x = embed_table[tokens]                          # (B, T, E)
    x = jnp.transpose(x, (1, 0, 2))                  # (T, B, E)
    hiddens = []
    layer_in = x
    for (w_ih, w_hh, b_ih, b_hh) in rnn_params:
        def step(h, x_t, w_ih=w_ih, w_hh=w_hh, b_ih=b_ih, b_hh=b_hh):
            h_new = jnp.tanh(x_t @ w_ih.T + b_ih + h @ w_hh.T + b_hh)
            return h_new, h_new
        h0 = jnp.zeros((layer_in.shape[1], w_hh.shape[0]), jnp.float32)
        _, ys = lax.scan(step, h0, layer_in)
        hiddens.append(ys[-1:])
        layer_in = ys
    output = jnp.transpose(layer_in, (1, 0, 2))
    hidden = jnp.concatenate(hiddens, axis=0)
    return output, hidden


def init_params(key, input_dim, embed_size, hidden_size, num_layers):
    """Deterministic parameter init mimicking PyTorch defaults."""
    k_embed, k_rnn = jax.random.split(key)
    # nn.Embedding: N(0, 1)
    embed_table = jax.random.normal(k_embed, (input_dim, embed_size), jnp.float32)

    # nn.RNN: U(-1/sqrt(H), 1/sqrt(H)) for all weights/biases.
    bound = 1.0 / jnp.sqrt(hidden_size)
    rnn_params = []
    keys = jax.random.split(k_rnn, num_layers * 4)
    for layer in range(num_layers):
        in_size = embed_size if layer == 0 else hidden_size
        kw0, kw1, kb0, kb1 = keys[4 * layer: 4 * layer + 4]
        w_ih = jax.random.uniform(kw0, (hidden_size, in_size), jnp.float32, -bound, bound)
        w_hh = jax.random.uniform(kw1, (hidden_size, hidden_size), jnp.float32, -bound, bound)
        b_ih = jax.random.uniform(kb0, (hidden_size,), jnp.float32, -bound, bound)
        b_hh = jax.random.uniform(kb1, (hidden_size,), jnp.float32, -bound, bound)
        rnn_params.append((w_ih, w_hh, b_ih, b_hh))
    return embed_table, rnn_params


if __name__ == "__main__":
    # Small, deterministic config.
    INPUT_DIM = 16        # vocab size
    EMBED_SIZE = 32       # config.inp_embed_size
    HIDDEN_SIZE = 32      # config.hidden_size
    NUM_LAYERS = 1        # config.num_enc_layers
    BATCH = 2
    SEQ = 8

    key = jax.random.PRNGKey(0)
    k_tok, k_param = jax.random.split(key)

    tokens = jax.random.randint(k_tok, (BATCH, SEQ), 0, INPUT_DIM, jnp.int32)
    embed_table, rnn_params = init_params(
        k_param, INPUT_DIM, EMBED_SIZE, HIDDEN_SIZE, NUM_LAYERS)

    output, hidden = encoder_forward(tokens, embed_table, rnn_params)
    jax.block_until_ready((output, hidden))

    assert output.shape == (BATCH, SEQ, HIDDEN_SIZE), output.shape
    assert hidden.shape == (NUM_LAYERS, BATCH, HIDDEN_SIZE), hidden.shape
    # Final-layer last-timestep output must equal the final hidden state (exact:
    # hidden is literally a slice of the kernel's output block).
    assert jnp.allclose(output[:, -1, :], hidden[-1], atol=1e-6)

    # Numerical check against a pure-JAX reference of the torch RNN semantics.
    out_ref, hid_ref = encoder_reference(tokens, embed_table, rnn_params)
    assert jnp.allclose(output, out_ref, atol=1e-3, rtol=1e-3)
    assert jnp.allclose(hidden, hid_ref, atol=1e-3, rtol=1e-3)

    print("KERNEL_OK")
</pallas_src>

<mosaic_0001>
module attributes {stable_mosaic.version = 11 : i64} {
  func.func @_rnn_recurrence_kernel(%arg0: memref<8x2x32xf32, #tpu.memory_space<vmem>>, %arg1: memref<32x32xf32, #tpu.memory_space<vmem>>, %arg2: memref<2x8x32xf32, #tpu.memory_space<vmem>>) attributes {dimension_semantics = [], scalar_prefetch = 0 : i64, scratch_operands = 0 : i64, tpu.core_type = #tpu.core_type<tc>} {
    %c0 = arith.constant 0 : index
    %c0_0 = arith.constant 0 : index
    %0 = vector.load %arg1[%c0, %c0_0] : memref<32x32xf32, #tpu.memory_space<vmem>>, vector<32x32xf32>
    %c0_1 = arith.constant 0 : index
    %c0_2 = arith.constant 0 : index
    %c0_3 = arith.constant 0 : index
    %1 = vector.load %arg0[%c0_1, %c0_2, %c0_3] : memref<8x2x32xf32, #tpu.memory_space<vmem>>, vector<1x2x32xf32>
    %2 = vector.shape_cast %1 : vector<1x2x32xf32> to vector<2x32xf32>
    %3 = math.tanh %2 : vector<2x32xf32>
    %c0_4 = arith.constant 0 : index
    %c0_5 = arith.constant 0 : index
    %c0_6 = arith.constant 0 : index
    %4 = vector.load %arg2[%c0_4, %c0_5, %c0_6] : memref<2x8x32xf32, #tpu.memory_space<vmem>>, vector<2x1x32xf32>
    %5 = vector.shape_cast %4 : vector<2x1x32xf32> to vector<2x32xf32>
    %6 = vector.shape_cast %3 : vector<2x32xf32> to vector<2x1x32xf32>
    tpu.vector_store %arg2[%c0_4, %c0_5, %c0_6], %6 {strides = array<i32>} : memref<2x8x32xf32, #tpu.memory_space<vmem>>, vector<2x1x32xf32>,
    %c1 = arith.constant 1 : index
    %c0_7 = arith.constant 0 : index
    %c0_8 = arith.constant 0 : index
    %7 = vector.load %arg0[%c1, %c0_7, %c0_8] : memref<8x2x32xf32, #tpu.memory_space<vmem>>, vector<1x2x32xf32>
    %8 = vector.shape_cast %7 : vector<1x2x32xf32> to vector<2x32xf32>
    %cst = arith.constant dense<0.000000e+00> : vector<2x32xf32>
    %9 = tpu.matmul %3, %0, %cst {dimension_numbers = #tpu.dot_dimension_numbers<[1], [0], [0], [1], [0, 0, 1, 1], [], []>} : vector<2x32xf32>, vector<32x32xf32>, vector<2x32xf32> -> vector<2x32xf32>
    %10 = arith.addf %8, %9 : vector<2x32xf32>
    %11 = math.tanh %10 : vector<2x32xf32>
    %c0_9 = arith.constant 0 : index
    %c1_10 = arith.constant 1 : index
    %c0_11 = arith.constant 0 : index
    %12 = vector.load %arg2[%c0_9, %c1_10, %c0_11] : memref<2x8x32xf32, #tpu.memory_space<vmem>>, vector<2x1x32xf32>
    %13 = vector.shape_cast %12 : vector<2x1x32xf32> to vector<2x32xf32>
    %14 = vector.shape_cast %11 : vector<2x32xf32> to vector<2x1x32xf32>
    tpu.vector_store %arg2[%c0_9, %c1_10, %c0_11], %14 {strides = array<i32>} : memref<2x8x32xf32, #tpu.memory_space<vmem>>, vector<2x1x32xf32>,
    %c2 = arith.constant 2 : index
    %c0_12 = arith.constant 0 : index
    %c0_13 = arith.constant 0 : index
    %15 = vector.load %arg0[%c2, %c0_12, %c0_13] : memref<8x2x32xf32, #tpu.memory_space<vmem>>, vector<1x2x32xf32>
    %16 = vector.shape_cast %15 : vector<1x2x32xf32> to vector<2x32xf32>
    %cst_14 = arith.constant dense<0.000000e+00> : vector<2x32xf32>
    %17 = tpu.matmul %11, %0, %cst_14 {dimension_numbers = #tpu.dot_dimension_numbers<[1], [0], [0], [1], [0, 0, 1, 1], [], []>} : vector<2x32xf32>, vector<32x32xf32>, vector<2x32xf32> -> vector<2x32xf32>
    %18 = arith.addf %16, %17 : vector<2x32xf32>
    %19 = math.tanh %18 : vector<2x32xf32>
    %c0_15 = arith.constant 0 : index
    %c2_16 = arith.constant 2 : index
    %c0_17 = arith.constant 0 : index
    %20 = vector.load %arg2[%c0_15, %c2_16, %c0_17] : memref<2x8x32xf32, #tpu.memory_space<vmem>>, vector<2x1x32xf32>
    %21 = vector.shape_cast %20 : vector<2x1x32xf32> to vector<2x32xf32>
    %22 = vector.shape_cast %19 : vector<2x32xf32> to vector<2x1x32xf32>
    tpu.vector_store %arg2[%c0_15, %c2_16, %c0_17], %22 {strides = array<i32>} : memref<2x8x32xf32, #tpu.memory_space<vmem>>, vector<2x1x32xf32>,
    %c3 = arith.constant 3 : index
    %c0_18 = arith.constant 0 : index
    %c0_19 = arith.constant 0 : index
    %23 = vector.load %arg0[%c3, %c0_18, %c0_19] : memref<8x2x32xf32, #tpu.memory_space<vmem>>, vector<1x2x32xf32>
    %24 = vector.shape_cast %23 : vector<1x2x32xf32> to vector<2x32xf32>
    %cst_20 = arith.constant dense<0.000000e+00> : vector<2x32xf32>
    %25 = tpu.matmul %19, %0, %cst_20 {dimension_numbers = #tpu.dot_dimension_numbers<[1], [0], [0], [1], [0, 0, 1, 1], [], []>} : vector<2x32xf32>, vector<32x32xf32>, vector<2x32xf32> -> vector<2x32xf32>
    %26 = arith.addf %24, %25 : vector<2x32xf32>
    %27 = math.tanh %26 : vector<2x32xf32>
    %c0_21 = arith.constant 0 : index
    %c3_22 = arith.constant 3 : index
    %c0_23 = arith.constant 0 : index
    %28 = vector.load %arg2[%c0_21, %c3_22, %c0_23] : memref<2x8x32xf32, #tpu.memory_space<vmem>>, vector<2x1x32xf32>
    %29 = vector.shape_cast %28 : vector<2x1x32xf32> to vector<2x32xf32>
    %30 = vector.shape_cast %27 : vector<2x32xf32> to vector<2x1x32xf32>
    tpu.vector_store %arg2[%c0_21, %c3_22, %c0_23], %30 {strides = array<i32>} : memref<2x8x32xf32, #tpu.memory_space<vmem>>, vector<2x1x32xf32>,
    %c4 = arith.constant 4 : index
    %c0_24 = arith.constant 0 : index
    %c0_25 = arith.constant 0 : index
    %31 = vector.load %arg0[%c4, %c0_24, %c0_25] : memref<8x2x32xf32, #tpu.memory_space<vmem>>, vector<1x2x32xf32>
    %32 = vector.shape_cast %31 : vector<1x2x32xf32> to vector<2x32xf32>
    %cst_26 = arith.constant dense<0.000000e+00> : vector<2x32xf32>
    %33 = tpu.matmul %27, %0, %cst_26 {dimension_numbers = #tpu.dot_dimension_numbers<[1], [0], [0], [1], [0, 0, 1, 1], [], []>} : vector<2x32xf32>, vector<32x32xf32>, vector<2x32xf32> -> vector<2x32xf32>
    %34 = arith.addf %32, %33 : vector<2x32xf32>
    %35 = math.tanh %34 : vector<2x32xf32>
    %c0_27 = arith.constant 0 : index
    %c4_28 = arith.constant 4 : index
    %c0_29 = arith.constant 0 : index
    %36 = vector.load %arg2[%c0_27, %c4_28, %c0_29] : memref<2x8x32xf32, #tpu.memory_space<vmem>>, vector<2x1x32xf32>
    %37 = vector.shape_cast %36 : vector<2x1x32xf32> to vector<2x32xf32>
    %38 = vector.shape_cast %35 : vector<2x32xf32> to vector<2x1x32xf32>
    tpu.vector_store %arg2[%c0_27, %c4_28, %c0_29], %38 {strides = array<i32>} : memref<2x8x32xf32, #tpu.memory_space<vmem>>, vector<2x1x32xf32>,
    %c5 = arith.constant 5 : index
    %c0_30 = arith.constant 0 : index
    %c0_31 = arith.constant 0 : index
    %39 = vector.load %arg0[%c5, %c0_30, %c0_31] : memref<8x2x32xf32, #tpu.memory_space<vmem>>, vector<1x2x32xf32>
    %40 = vector.shape_cast %39 : vector<1x2x32xf32> to vector<2x32xf32>
    %cst_32 = arith.constant dense<0.000000e+00> : vector<2x32xf32>
    %41 = tpu.matmul %35, %0, %cst_32 {dimension_numbers = #tpu.dot_dimension_numbers<[1], [0], [0], [1], [0, 0, 1, 1], [], []>} : vector<2x32xf32>, vector<32x32xf32>, vector<2x32xf32> -> vector<2x32xf32>
    %42 = arith.addf %40, %41 : vector<2x32xf32>
    %43 = math.tanh %42 : vector<2x32xf32>
    %c0_33 = arith.constant 0 : index
    %c5_34 = arith.constant 5 : index
    %c0_35 = arith.constant 0 : index
    %44 = vector.load %arg2[%c0_33, %c5_34, %c0_35] : memref<2x8x32xf32, #tpu.memory_space<vmem>>, vector<2x1x32xf32>
    %45 = vector.shape_cast %44 : vector<2x1x32xf32> to vector<2x32xf32>
    %46 = vector.shape_cast %43 : vector<2x32xf32> to vector<2x1x32xf32>
    tpu.vector_store %arg2[%c0_33, %c5_34, %c0_35], %46 {strides = array<i32>} : memref<2x8x32xf32, #tpu.memory_space<vmem>>, vector<2x1x32xf32>,
    %c6 = arith.constant 6 : index
    %c0_36 = arith.constant 0 : index
    %c0_37 = arith.constant 0 : index
    %47 = vector.load %arg0[%c6, %c0_36, %c0_37] : memref<8x2x32xf32, #tpu.memory_space<vmem>>, vector<1x2x32xf32>
    %48 = vector.shape_cast %47 : vector<1x2x32xf32> to vector<2x32xf32>
    %cst_38 = arith.constant dense<0.000000e+00> : vector<2x32xf32>
    %49 = tpu.matmul %43, %0, %cst_38 {dimension_numbers = #tpu.dot_dimension_numbers<[1], [0], [0], [1], [0, 0, 1, 1], [], []>} : vector<2x32xf32>, vector<32x32xf32>, vector<2x32xf32> -> vector<2x32xf32>
    %50 = arith.addf %48, %49 : vector<2x32xf32>
    %51 = math.tanh %50 : vector<2x32xf32>
    %c0_39 = arith.constant 0 : index
    %c6_40 = arith.constant 6 : index
    %c0_41 = arith.constant 0 : index
    %52 = vector.load %arg2[%c0_39, %c6_40, %c0_41] : memref<2x8x32xf32, #tpu.memory_space<vmem>>, vector<2x1x32xf32>
    %53 = vector.shape_cast %52 : vector<2x1x32xf32> to vector<2x32xf32>
    %54 = vector.shape_cast %51 : vector<2x32xf32> to vector<2x1x32xf32>
    tpu.vector_store %arg2[%c0_39, %c6_40, %c0_41], %54 {strides = array<i32>} : memref<2x8x32xf32, #tpu.memory_space<vmem>>, vector<2x1x32xf32>,
    %c7 = arith.constant 7 : index
    %c0_42 = arith.constant 0 : index
    %c0_43 = arith.constant 0 : index
    %55 = vector.load %arg0[%c7, %c0_42, %c0_43] : memref<8x2x32xf32, #tpu.memory_space<vmem>>, vector<1x2x32xf32>
    %56 = vector.shape_cast %55 : vector<1x2x32xf32> to vector<2x32xf32>
    %cst_44 = arith.constant dense<0.000000e+00> : vector<2x32xf32>
    %57 = tpu.matmul %51, %0, %cst_44 {dimension_numbers = #tpu.dot_dimension_numbers<[1], [0], [0], [1], [0, 0, 1, 1], [], []>} : vector<2x32xf32>, vector<32x32xf32>, vector<2x32xf32> -> vector<2x32xf32>
    %58 = arith.addf %56, %57 : vector<2x32xf32>
    %59 = math.tanh %58 : vector<2x32xf32>
    %c0_45 = arith.constant 0 : index
    %c7_46 = arith.constant 7 : index
    %c0_47 = arith.constant 0 : index
    %60 = vector.load %arg2[%c0_45, %c7_46, %c0_47] : memref<2x8x32xf32, #tpu.memory_space<vmem>>, vector<2x1x32xf32>
    %61 = vector.shape_cast %60 : vector<2x1x32xf32> to vector<2x32xf32>
    %62 = vector.shape_cast %59 : vector<2x32xf32> to vector<2x1x32xf32>
    tpu.vector_store %arg2[%c0_45, %c7_46, %c0_47], %62 {strides = array<i32>} : memref<2x8x32xf32, #tpu.memory_space<vmem>>, vector<2x1x32xf32>,
    return
  }
}

</mosaic_0001>

<bundles_post_ra>
// kernel: encoder_forward.1
= control target key start
LH: loop header
LB: loop body
LE: loop exit
PB: predicated region body
PF: predicated region fallthrough
CT: control target
= control target key end

     0   :  { %vm25_vm0 = vcmask 261120   ;;  %vm20_vm1 = vcmask 253952   ;;  %s397_s1 = inlined_call_operand.vmem [shape: f32[32,32], index: 1, kind: input, shape index: {}]   ;;  %s398_s0 = inlined_call_operand.vmem [shape: f32[8,2,32], index: 0, kind: input, shape index: {}]   ;;  %s399_s2 = inlined_call_operand.vmem [shape: f32[2,8,32], index: 2, kind: output, shape index: {}]  }
   0x1   :  { %v14_v0 = vld [vmem:[%s397_s1 + $0x18] sm:$0xff]  ;;  %v13_v1 = vld [vmem:[%s397_s1 + $0x10] sm:$0xff]  ;;  %v15_v2 = vld [vmem:[%s398_s0] sm:$0x3] }
   0x2   :  { %40 = vmatpush.msra.mxu0 %v14_v0  ;;  %71 = vmatpush.msra.mxu1 %v14_v0  ;;  %v12_v3 = vld [vmem:[%s397_s1 + $0x8] sm:$0xff]  ;;  %259 = vtanh.f32 %v15_v2  ;;  %v11_v4 = vld [vmem:[%s397_s1] sm:$0xff] }
   0x3   :  { %102 = vmatpush.msra.mxu2 %v14_v0  ;;  %133 = vmatpush.msra.mxu3 %v14_v0  ;;  %v245_v7 = vld [vmem:[%s398_s0 + $0x2] sm:$0x3]  ;;  %v247_v12 = vld [vmem:[%s398_s0 + $0x4] sm:$0x3]  ;;  %v249_v17 = vld [vmem:[%s398_s0 + $0x6] sm:$0x3] }
   0x4   :  { %41 = vmatpush.msra.mxu0 %v13_v1  ;;  %72 = vmatpush.msra.mxu1 %v13_v1  ;;  %v251_v22 = vld [vmem:[%s398_s0 + $0x8] sm:$0x3]  ;;  %v253_v27 = vld [vmem:[%s398_s0 + $0xa] sm:$0x3]  ;;  %v255_v32 = vld [vmem:[%s398_s0 + $0xc] sm:$0x3] }
   0x5   :  { %103 = vmatpush.msra.mxu2 %v13_v1  ;;  %134 = vmatpush.msra.mxu3 %v13_v1  ;;  %v257_v37 = vld [vmem:[%s398_s0 + $0xe] sm:$0x3] }
   0x6   :  { %42 = vmatpush.msra.mxu0 %v12_v3  ;;  %73 = vmatpush.msra.mxu1 %v12_v3 }
   0x7   :  { %104 = vmatpush.msra.mxu2 %v12_v3  ;;  %135 = vmatpush.msra.mxu3 %v12_v3 }
   0x8   :  { %43 = vmatpush.msra.mxu0 %v11_v4  ;;  %74 = vmatpush.msra.mxu1 %v11_v4  ;;  %v260_v5 = vpop.eup %259 }
   0x9   :  { %105 = vmatpush.msra.mxu2 %v11_v4  ;;  %136 = vmatpush.msra.mxu3 %v11_v4  ;;  %v18_v6 = vrot.slane %v260_v5, 1  ;;  %21 = vst.msk [vmem:[%s399_s2] sm:$0x1] %vm20_vm1, %v260_v5 }
   0xa   :  { %246 = vmatmul.msk.f32.vlgmr.msra.gmra.mxu0 %vm25_vm0, %v260_v5  ;;  %195 = vmatpush.msrb.mxu1 %v14_v0 }
   0xb   :  { %164 = vmatpush.msrb.mxu0 %v14_v0  ;;  %226 = vmatpush.msrb.mxu2 %v14_v0  ;;  %22 = vst.msk [vmem:[%s399_s2 + $0x8] sm:$0x1] %vm20_vm1, %v18_v6 }
   0xc   :  { %196 = vmatpush.msrb.mxu1 %v13_v1 }
   0xd   :  { %165 = vmatpush.msrb.mxu0 %v13_v1  ;;  %227 = vmatpush.msrb.mxu2 %v13_v1 }
   0xe   :  { %197 = vmatpush.msrb.mxu1 %v12_v3 }
   0xf   :  { %166 = vmatpush.msrb.mxu0 %v12_v3  ;;  %228 = vmatpush.msrb.mxu2 %v12_v3 }
  0x10   :  { %198 = vmatpush.msrb.mxu1 %v11_v4 }
  0x11   :  { %167 = vmatpush.msrb.mxu0 %v11_v4  ;;  %229 = vmatpush.msrb.mxu2 %v11_v4 }
  0x87   :  { %v45_v8 = vpop.f32.mrf.mxu0 }
  0x88   :  { %v48_v9 = vadd.f32 %v245_v7, %v45_v8 }
  0x8a   :  { %261 = vtanh.f32 %v48_v9 }
  0x90   :  { %v262_v10 = vpop.eup %261 }
  0x91   :  { %v51_v11 = vrot.slane %v262_v10, 1  ;;  %53 = vst.msk [vmem:[%s399_s2 + $0x1] sm:$0x1] %vm20_vm1, %v262_v10  ;;  %248 = vmatmul.msk.f32.vlgmr.msra.gmra.mxu1 %vm25_vm0, %v262_v10 }
  0x93   :  { %54 = vst.msk [vmem:[%s399_s2 + $0x9] sm:$0x1] %vm20_vm1, %v51_v11 }
 0x10e   :  { %v76_v13 = vpop.f32.mrf.mxu1 }
 0x10f   :  { %v79_v14 = vadd.f32 %v247_v12, %v76_v13 }
 0x111   :  { %263 = vtanh.f32 %v79_v14 }
 0x117   :  { %v264_v15 = vpop.eup %263 }
 0x118   :  { %v82_v16 = vrot.slane %v264_v15, 1  ;;  %84 = vst.msk [vmem:[%s399_s2 + $0x2] sm:$0x1] %vm20_vm1, %v264_v15  ;;  %250 = vmatmul.msk.f32.vlgmr.msra.gmra.mxu2 %vm25_vm0, %v264_v15 }
 0x11a   :  { %85 = vst.msk [vmem:[%s399_s2 + $0xa] sm:$0x1] %vm20_vm1, %v82_v16 }
 0x19b   :  { %v107_v18 = vpop.f32.mrf.mxu2 }
 0x19c   :  { %v110_v19 = vadd.f32 %v249_v17, %v107_v18 }
 0x19e   :  { %265 = vtanh.f32 %v110_v19 }
 0x1a4   :  { %v266_v20 = vpop.eup %265 }
 0x1a5   :  { %v113_v21 = vrot.slane %v266_v20, 1  ;;  %115 = vst.msk [vmem:[%s399_s2 + $0x3] sm:$0x1] %vm20_vm1, %v266_v20  ;;  %252 = vmatmul.msk.f32.vlgmr.msra.gmra.mxu3 %vm25_vm0, %v266_v20 }
 0x1a7   :  { %116 = vst.msk [vmem:[%s399_s2 + $0xb] sm:$0x1] %vm20_vm1, %v113_v21 }
 0x228   :  { %v138_v23 = vpop.f32.mrf.mxu3 }
 0x229   :  { %v141_v24 = vadd.f32 %v251_v22, %v138_v23 }
 0x22b   :  { %267 = vtanh.f32 %v141_v24 }
 0x231   :  { %v268_v25 = vpop.eup %267 }
 0x232   :  { %v144_v26 = vrot.slane %v268_v25, 1  ;;  %146 = vst.msk [vmem:[%s399_s2 + $0x4] sm:$0x1] %vm20_vm1, %v268_v25  ;;  %254 = vmatmul.msk.f32.vlgmr.msrb.gmra.mxu0 %vm25_vm0, %v268_v25 }
 0x234   :  { %147 = vst.msk [vmem:[%s399_s2 + $0xc] sm:$0x1] %vm20_vm1, %v144_v26 }
 0x2af   :  { %v169_v28 = vpop.f32.mrf.mxu0 }
 0x2b0   :  { %v172_v29 = vadd.f32 %v253_v27, %v169_v28 }
 0x2b2   :  { %269 = vtanh.f32 %v172_v29 }
 0x2b8   :  { %v270_v30 = vpop.eup %269 }
 0x2b9   :  { %v175_v31 = vrot.slane %v270_v30, 1  ;;  %177 = vst.msk [vmem:[%s399_s2 + $0x5] sm:$0x1] %vm20_vm1, %v270_v30  ;;  %256 = vmatmul.msk.f32.vlgmr.msrb.gmra.mxu1 %vm25_vm0, %v270_v30 }
 0x2bb   :  { %178 = vst.msk [vmem:[%s399_s2 + $0xd] sm:$0x1] %vm20_vm1, %v175_v31 }
 0x336   :  { %v200_v33 = vpop.f32.mrf.mxu1 }
 0x337   :  { %v203_v34 = vadd.f32 %v255_v32, %v200_v33 }
 0x339   :  { %271 = vtanh.f32 %v203_v34 }
 0x33f   :  { %v272_v35 = vpop.eup %271 }
 0x340   :  { %v206_v36 = vrot.slane %v272_v35, 1  ;;  %208 = vst.msk [vmem:[%s399_s2 + $0x6] sm:$0x1] %vm20_vm1, %v272_v35  ;;  %258 = vmatmul.msk.f32.vlgmr.msrb.gmra.mxu2 %vm25_vm0, %v272_v35 }
 0x342   :  { %209 = vst.msk [vmem:[%s399_s2 + $0xe] sm:$0x1] %vm20_vm1, %v206_v36 }
 0x3c3   :  { %v231_v38 = vpop.f32.mrf.mxu2 }
 0x3c4   :  { %v234_v39 = vadd.f32 %v257_v37, %v231_v38 }
 0x3c6   :  { %273 = vtanh.f32 %v234_v39 }
 0x3cc   :  { %v274_v40 = vpop.eup %273 }
 0x3cd   :  { %v237_v41 = vrot.slane %v274_v40, 1  ;;  %239 = vst.msk [vmem:[%s399_s2 + $0x7] sm:$0x1] %vm20_vm1, %v274_v40 }
 0x3cf   :  { %240 = vst.msk [vmem:[%s399_s2 + $0xf] sm:$0x1] %vm20_vm1, %v237_v41 }

</bundles_post_ra>
